<compile_context>
chip_gen: v7x
topology: tpu7x:2x2x1
jax: 0.10.0
libtpu: 0.0.40
codegen_flags: <defaults>
</compile_context>

<pallas_src>
import functools

import jax
import jax.numpy as jnp
from jax import lax
from jax.experimental import pallas as pl
from jax.experimental.pallas import tpu as pltpu


def _spectral_mul_kernel(xr_ref, xi_ref, wr_ref, wi_ref, or_ref, oi_ref, *, kc):
    """One grid step (j, k) = (Cout tile, block of kc input channels).

    xr/xi : (kc, B, Mp)    kc input channels' kept modes for the whole batch
    wr/wi : (kc, Tco, Mp)  those channels' weights for the current Cout tile
    or/oi : (B, Tco, Mp)   accumulator planes, resident across the k (Cin) axis
    """
    k = pl.program_id(1)

    @pl.when(k == 0)
    def _():
        or_ref[...] = jnp.zeros_like(or_ref)
        oi_ref[...] = jnp.zeros_like(oi_ref)

    def body(c, carry):
        acc_r, acc_i = carry
        xr = xr_ref[c]                                   # (B, Mp)
        xi = xi_ref[c]
        wr = wr_ref[c]                                   # (Tco, Mp)
        wi = wi_ref[c]
        # Gauss 3-multiply complex product:
        #   (xr + j xi)(wr + j wi) = (k1 - k3) + j (k1 + k2)
        # with k1 = (xr + xi) wr, k2 = xr (wi - wr), k3 = xi (wr + wi).
        # Weight combinations are formed once per channel, not per output row.
        k1 = (xr + xi)[:, None, :] * wr[None, :, :]      # (B, Tco, Mp)
        k2 = xr[:, None, :] * (wi - wr)[None, :, :]
        k3 = xi[:, None, :] * (wr + wi)[None, :, :]
        return acc_r + (k1 - k3), acc_i + (k1 + k2)

    zero = jnp.zeros(or_ref.shape, jnp.float32)
    acc_r, acc_i = lax.fori_loop(0, kc, body, (zero, zero), unroll=True)

    # Single read-modify-write of each resident accumulator plane per grid step
    # (instead of one RMW per input channel).
    or_ref[...] += acc_r
    oi_ref[...] += acc_i


def _block_bytes(b, kc, tco, mp):
    """f32 bytes of all pipeline blocks: double-buffered x/w input planes plus
    both (double-buffered) output accumulator planes."""
    return 4 * (2 * 2 * kc * b * mp        # xr, xi blocks
                + 2 * 2 * kc * tco * mp    # wr, wi blocks
                + 2 * 2 * b * tco * mp)    # or, oi blocks


def _select_tiling(b, cin, cout, mp):
    """Generation-aware choice of (Kc, Cout_padded, Tco, vmem_limit_bytes)."""
    try:
        vmem_cap = int(pltpu.get_tpu_info().vmem_capacity_bytes)
    except Exception:
        vmem_cap = 64 << 20                        # conservative fallback
    small_vmem = vmem_cap <= (64 << 20)            # v7x-class: 64 MiB/TC, 2 TCs/chip
    two_cores = small_vmem
    budget = (36 << 20) if small_vmem else (80 << 20)
    limit_cap = (48 << 20) if small_vmem else (100 << 20)

    kc_opts = [d for d in range(min(cin, 8), 0, -1) if cin % d == 0]

    def cout_candidates():
        cands = []
        if cout % 8 != 0:
            cands.append((cout, cout))             # single full-extent block (legal)
        cp = -(-cout // 8) * 8                     # == cout when already multiple of 8
        cands += [(cp, d) for d in range(cp, 7, -1) if cp % d == 0 and d % 8 == 0]
        return cands

    chosen = None
    for kc in kc_opts:
        fitting = [(cp, t) for (cp, t) in cout_candidates()
                   if _block_bytes(b, kc, t, mp) <= budget]
        if not fitting:
            continue
        pick = fitting[0]                          # largest fitting tile (J minimal)
        if two_cores:
            # Prefer J >= 2 so both TensorCores get a 'parallel' slice of the grid.
            two = [(cp, t) for (cp, t) in fitting if cp // t >= 2]
            if two:
                pick = two[0]
        chosen = (kc, pick[0], pick[1])
        break

    if chosen is None:
        # Nothing fits the soft budget: smallest legal tiling; hard assert below.
        cp, t = min(cout_candidates(), key=lambda cd: cd[1])
        chosen = (1, cp, t)

    kc, cp, tco = chosen
    blk = _block_bytes(b, kc, tco, mp)
    assert blk <= vmem_cap, (
        f"SpectralConv2d Pallas block footprint ({blk >> 20} MiB) exceeds the "
        f"physical VMEM capacity ({vmem_cap >> 20} MiB).")
    vmem_limit = int(min(max(blk + (8 << 20), 32 << 20), limit_cap))
    return kc, cp, tco, vmem_limit


def spectral_conv2d(x, weights1, weights2, modes1, modes2):
    """Forward pass of SpectralConv2d. x: (B, Cin, H, W) float32."""
    B, Cin, H, W = x.shape
    Cout = weights1.shape[1]
    Wf = W // 2 + 1
    assert modes1 <= H and modes2 <= Wf

    # TODO(synk): rfft2/irfft2 have no Pallas equivalent; done in plain JAX/XLA.
    x_ft = jnp.fft.rfft2(x)                                # (B, Cin, H, Wf) complex64
    x_modes = jnp.concatenate(
        [x_ft[:, :, :modes1, :modes2], x_ft[:, :, H - modes1:, :modes2]], axis=2)

    # Merge the two mode slabs on the lane axis: (B, Cin, 2*m1, m2) -> (Cin, B, M).
    M = 2 * modes1 * modes2
    Mp = -(-M // 128) * 128                                # lane-dense last dim
    xs = jnp.transpose(x_modes, (1, 0, 2, 3)).reshape(Cin, B, M)
    ws = jnp.concatenate([weights1, weights2], axis=2).reshape(Cin, Cout, M)

    Kc, Cp, Tco, vmem_limit = _select_tiling(B, Cin, Cout, Mp)
    J = Cp // Tco
    KS = Cin // Kc

    pad_x = [(0, 0), (0, 0), (0, Mp - M)]
    pad_w = [(0, 0), (0, Cp - Cout), (0, Mp - M)]
    xr = jnp.pad(jnp.real(xs).astype(jnp.float32), pad_x)  # (Cin, B, Mp)
    xi = jnp.pad(jnp.imag(xs).astype(jnp.float32), pad_x)
    wr = jnp.pad(jnp.real(ws).astype(jnp.float32), pad_w)  # (Cin, Cp, Mp)
    wi = jnp.pad(jnp.imag(ws).astype(jnp.float32), pad_w)

    x_spec = pl.BlockSpec((Kc, B, Mp), lambda j, k: (k, 0, 0))
    w_spec = pl.BlockSpec((Kc, Tco, Mp), lambda j, k: (k, j, 0))
    o_spec = pl.BlockSpec((B, Tco, Mp), lambda j, k: (0, j, 0))

    flops = 8 * B * Cin * Cp * Mp
    bytes_accessed = 4 * (2 * J * Cin * B * Mp             # x planes (re-fetched per j)
                          + 2 * Cin * Cp * Mp              # w planes
                          + 2 * B * Cp * Mp)               # output planes

    out_r, out_i = pl.pallas_call(
        functools.partial(_spectral_mul_kernel, kc=Kc),
        out_shape=(
            jax.ShapeDtypeStruct((B, Cp, Mp), jnp.float32),
            jax.ShapeDtypeStruct((B, Cp, Mp), jnp.float32),
        ),
        grid=(J, KS),
        in_specs=[x_spec, x_spec, w_spec, w_spec],
        out_specs=(o_spec, o_spec),
        compiler_params=pltpu.CompilerParams(
            dimension_semantics=("parallel", "arbitrary"),
            vmem_limit_bytes=vmem_limit),
        cost_estimate=pl.CostEstimate(
            flops=flops, transcendentals=0, bytes_accessed=bytes_accessed),
    )(xr, xi, wr, wi)

    out_c = (out_r[:, :Cout, :M] + 1j * out_i[:, :Cout, :M]).astype(jnp.complex64)
    out_c = out_c.reshape(B, Cout, 2 * modes1, modes2)

    out_ft = jnp.zeros((B, Cout, H, Wf), dtype=jnp.complex64)
    out_ft = out_ft.at[:, :, :modes1, :modes2].set(out_c[:, :, :modes1])
    out_ft = out_ft.at[:, :, H - modes1:, :modes2].set(out_c[:, :, modes1:])

    return jnp.fft.irfft2(out_ft, s=(H, W))                # (B, Cout, H, W) float32


def _reference(x, weights1, weights2, modes1, modes2):
    """Pure-JAX reference mirroring the PyTorch forward exactly."""
    B, Cin, H, W = x.shape
    Cout = weights1.shape[1]
    x_ft = jnp.fft.rfft2(x)
    out_ft = jnp.zeros((B, Cout, H, W // 2 + 1), dtype=jnp.complex64)
    out_ft = out_ft.at[:, :, :modes1, :modes2].set(
        jnp.einsum('bixy,ioxy->boxy', x_ft[:, :, :modes1, :modes2], weights1))
    out_ft = out_ft.at[:, :, H - modes1:, :modes2].set(
        jnp.einsum('bixy,ioxy->boxy', x_ft[:, :, H - modes1:, :modes2], weights2))
    return jnp.fft.irfft2(out_ft, s=(H, W))


if __name__ == "__main__":
    # Small, deterministic example consistent with the module.
    B, Cin, Cout, H, W = 2, 4, 4, 16, 16
    modes1, modes2 = 6, 6                 # modes1 <= H, modes2 <= W//2 + 1

    key = jax.random.PRNGKey(0)
    kx, kw1r, kw1i, kw2r, kw2i = jax.random.split(key, 5)

    x = jax.random.normal(kx, (B, Cin, H, W), dtype=jnp.float32)

    scale = 1.0 / (Cin * Cout)
    # torch.rand(..., dtype=cfloat): real & imag uniform in [0, 1), scaled.
    weights1 = (scale * jax.random.uniform(kw1r, (Cin, Cout, modes1, modes2))
                + 1j * scale * jax.random.uniform(kw1i, (Cin, Cout, modes1, modes2))
                ).astype(jnp.complex64)
    weights2 = (scale * jax.random.uniform(kw2r, (Cin, Cout, modes1, modes2))
                + 1j * scale * jax.random.uniform(kw2i, (Cin, Cout, modes1, modes2))
                ).astype(jnp.complex64)

    out = spectral_conv2d(x, weights1, weights2, modes1, modes2)
    out = jax.block_until_ready(out)

    ref = jax.block_until_ready(_reference(x, weights1, weights2, modes1, modes2))
    assert out.shape == (B, Cout, H, W)
    assert out.dtype == jnp.float32
    assert jnp.allclose(out, ref, atol=1e-5, rtol=1e-5), "mismatch vs reference"

    print("KERNEL_OK")
</pallas_src>

<mosaic_0001>
module attributes {stable_mosaic.version = 11 : i64} {
  func.func @_spectral_mul_kernel(%arg0: i32, %arg1: i32, %arg2: memref<4x2x128xf32, #tpu.memory_space<vmem>>, %arg3: memref<4x2x128xf32, #tpu.memory_space<vmem>>, %arg4: memref<4x4x128xf32, #tpu.memory_space<vmem>>, %arg5: memref<4x4x128xf32, #tpu.memory_space<vmem>>, %arg6: memref<2x4x128xf32, #tpu.memory_space<vmem>>, %arg7: memref<2x4x128xf32, #tpu.memory_space<vmem>>) attributes {dimension_semantics = [#tpu.dimension_semantics<parallel>, #tpu.dimension_semantics<arbitrary>], iteration_bounds = array<i64: 1, 1>, scalar_prefetch = 0 : i64, scratch_operands = 0 : i64, tpu.core_type = #tpu.core_type<tc>, window_params = [{transform_indices = @transform_0, window_bounds = array<i64: 4, 2, 128>}, {transform_indices = @transform_1, window_bounds = array<i64: 4, 2, 128>}, {transform_indices = @transform_2, window_bounds = array<i64: 4, 4, 128>}, {transform_indices = @transform_3, window_bounds = array<i64: 4, 4, 128>}, {transform_indices = @transform_4, window_bounds = array<i64: 2, 4, 128>}, {transform_indices = @transform_5, window_bounds = array<i64: 2, 4, 128>}]} {
    %c0_i32 = arith.constant 0 : i32
    %0 = arith.cmpi eq, %arg1, %c0_i32 : i32
    %1 = arith.extui %0 : i1 to i32
    %c0_i32_0 = arith.constant 0 : i32
    %2 = arith.cmpi ne, %1, %c0_i32_0 : i32
    scf.if %2 {
      %cst_45 = arith.constant 0.000000e+00 : f32
      %146 = vector.broadcast %cst_45 : f32 to vector<2x4x128xf32>
      %c0_46 = arith.constant 0 : index
      %c0_47 = arith.constant 0 : index
      %c0_48 = arith.constant 0 : index
      %147 = vector.load %arg6[%c0_46, %c0_47, %c0_48] : memref<2x4x128xf32, #tpu.memory_space<vmem>>, vector<2x4x128xf32>
      tpu.vector_store %arg6[%c0_46, %c0_47, %c0_48], %146 {strides = array<i32>} : memref<2x4x128xf32, #tpu.memory_space<vmem>>, vector<2x4x128xf32>,
      %cst_49 = arith.constant 0.000000e+00 : f32
      %148 = vector.broadcast %cst_49 : f32 to vector<2x4x128xf32>
      %c0_50 = arith.constant 0 : index
      %c0_51 = arith.constant 0 : index
      %c0_52 = arith.constant 0 : index
      %149 = vector.load %arg7[%c0_50, %c0_51, %c0_52] : memref<2x4x128xf32, #tpu.memory_space<vmem>>, vector<2x4x128xf32>
      tpu.vector_store %arg7[%c0_50, %c0_51, %c0_52], %148 {strides = array<i32>} : memref<2x4x128xf32, #tpu.memory_space<vmem>>, vector<2x4x128xf32>,
    } else {
    }
    %cst = arith.constant 0.000000e+00 : f32
    %3 = vector.broadcast %cst : f32 to vector<2x4x128xf32>
    %c0_i32_1 = arith.constant 0 : i32
    %4 = arith.index_cast %c0_i32_1 : i32 to index
    %c0 = arith.constant 0 : index
    %c0_2 = arith.constant 0 : index
    %5 = vector.load %arg2[%4, %c0, %c0_2] : memref<4x2x128xf32, #tpu.memory_space<vmem>>, vector<1x2x128xf32>
    %6 = vector.shape_cast %5 : vector<1x2x128xf32> to vector<2x128xf32>
    %7 = arith.index_cast %c0_i32_1 : i32 to index
    %c0_3 = arith.constant 0 : index
    %c0_4 = arith.constant 0 : index
    %8 = vector.load %arg3[%7, %c0_3, %c0_4] : memref<4x2x128xf32, #tpu.memory_space<vmem>>, vector<1x2x128xf32>
    %9 = vector.shape_cast %8 : vector<1x2x128xf32> to vector<2x128xf32>
    %10 = arith.index_cast %c0_i32_1 : i32 to index
    %c0_5 = arith.constant 0 : index
    %c0_6 = arith.constant 0 : index
    %11 = vector.load %arg4[%10, %c0_5, %c0_6] : memref<4x4x128xf32, #tpu.memory_space<vmem>>, vector<1x4x128xf32>
    %12 = vector.shape_cast %11 : vector<1x4x128xf32> to vector<4x128xf32>
    %13 = arith.index_cast %c0_i32_1 : i32 to index
    %c0_7 = arith.constant 0 : index
    %c0_8 = arith.constant 0 : index
    %14 = vector.load %arg5[%13, %c0_7, %c0_8] : memref<4x4x128xf32, #tpu.memory_space<vmem>>, vector<1x4x128xf32>
    %15 = vector.shape_cast %14 : vector<1x4x128xf32> to vector<4x128xf32>
    %16 = arith.addf %6, %9 : vector<2x128xf32>
    %17 = vector.shape_cast %16 : vector<2x128xf32> to vector<2x1x128xf32>
    %18 = vector.shape_cast %12 : vector<4x128xf32> to vector<1x4x128xf32>
    %19 = vector.broadcast %17 : vector<2x1x128xf32> to vector<2x4x128xf32>
    %20 = vector.broadcast %18 : vector<1x4x128xf32> to vector<2x4x128xf32>
    %21 = arith.mulf %19, %20 : vector<2x4x128xf32>
    %22 = vector.shape_cast %6 : vector<2x128xf32> to vector<2x1x128xf32>
    %23 = arith.subf %15, %12 : vector<4x128xf32>
    %24 = vector.shape_cast %23 : vector<4x128xf32> to vector<1x4x128xf32>
    %25 = vector.broadcast %22 : vector<2x1x128xf32> to vector<2x4x128xf32>
    %26 = vector.broadcast %24 : vector<1x4x128xf32> to vector<2x4x128xf32>
    %27 = arith.mulf %25, %26 : vector<2x4x128xf32>
    %28 = vector.shape_cast %9 : vector<2x128xf32> to vector<2x1x128xf32>
    %29 = arith.addf %12, %15 : vector<4x128xf32>
    %30 = vector.shape_cast %29 : vector<4x128xf32> to vector<1x4x128xf32>
    %31 = vector.broadcast %28 : vector<2x1x128xf32> to vector<2x4x128xf32>
    %32 = vector.broadcast %30 : vector<1x4x128xf32> to vector<2x4x128xf32>
    %33 = arith.mulf %31, %32 : vector<2x4x128xf32>
    %34 = arith.subf %21, %33 : vector<2x4x128xf32>
    %35 = arith.addf %3, %34 : vector<2x4x128xf32>
    %36 = arith.addf %21, %27 : vector<2x4x128xf32>
    %37 = arith.addf %3, %36 : vector<2x4x128xf32>
    %c1_i32 = arith.constant 1 : i32
    %38 = arith.index_cast %c1_i32 : i32 to index
    %c0_9 = arith.constant 0 : index
    %c0_10 = arith.constant 0 : index
    %39 = vector.load %arg2[%38, %c0_9, %c0_10] : memref<4x2x128xf32, #tpu.memory_space<vmem>>, vector<1x2x128xf32>
    %40 = vector.shape_cast %39 : vector<1x2x128xf32> to vector<2x128xf32>
    %41 = arith.index_cast %c1_i32 : i32 to index
    %c0_11 = arith.constant 0 : index
    %c0_12 = arith.constant 0 : index
    %42 = vector.load %arg3[%41, %c0_11, %c0_12] : memref<4x2x128xf32, #tpu.memory_space<vmem>>, vector<1x2x128xf32>
    %43 = vector.shape_cast %42 : vector<1x2x128xf32> to vector<2x128xf32>
    %44 = arith.index_cast %c1_i32 : i32 to index
    %c0_13 = arith.constant 0 : index
    %c0_14 = arith.constant 0 : index
    %45 = vector.load %arg4[%44, %c0_13, %c0_14] : memref<4x4x128xf32, #tpu.memory_space<vmem>>, vector<1x4x128xf32>
    %46 = vector.shape_cast %45 : vector<1x4x128xf32> to vector<4x128xf32>
    %47 = arith.index_cast %c1_i32 : i32 to index
    %c0_15 = arith.constant 0 : index
    %c0_16 = arith.constant 0 : index
    %48 = vector.load %arg5[%47, %c0_15, %c0_16] : memref<4x4x128xf32, #tpu.memory_space<vmem>>, vector<1x4x128xf32>
    %49 = vector.shape_cast %48 : vector<1x4x128xf32> to vector<4x128xf32>
    %50 = arith.addf %40, %43 : vector<2x128xf32>
    %51 = vector.shape_cast %50 : vector<2x128xf32> to vector<2x1x128xf32>
    %52 = vector.shape_cast %46 : vector<4x128xf32> to vector<1x4x128xf32>
    %53 = vector.broadcast %51 : vector<2x1x128xf32> to vector<2x4x128xf32>
    %54 = vector.broadcast %52 : vector<1x4x128xf32> to vector<2x4x128xf32>
    %55 = arith.mulf %53, %54 : vector<2x4x128xf32>
    %56 = vector.shape_cast %40 : vector<2x128xf32> to vector<2x1x128xf32>
    %57 = arith.subf %49, %46 : vector<4x128xf32>
    %58 = vector.shape_cast %57 : vector<4x128xf32> to vector<1x4x128xf32>
    %59 = vector.broadcast %56 : vector<2x1x128xf32> to vector<2x4x128xf32>
    %60 = vector.broadcast %58 : vector<1x4x128xf32> to vector<2x4x128xf32>
    %61 = arith.mulf %59, %60 : vector<2x4x128xf32>
    %62 = vector.shape_cast %43 : vector<2x128xf32> to vector<2x1x128xf32>
    %63 = arith.addf %46, %49 : vector<4x128xf32>
    %64 = vector.shape_cast %63 : vector<4x128xf32> to vector<1x4x128xf32>
    %65 = vector.broadcast %62 : vector<2x1x128xf32> to vector<2x4x128xf32>
    %66 = vector.broadcast %64 : vector<1x4x128xf32> to vector<2x4x128xf32>
    %67 = arith.mulf %65, %66 : vector<2x4x128xf32>
    %68 = arith.subf %55, %67 : vector<2x4x128xf32>
    %69 = arith.addf %35, %68 : vector<2x4x128xf32>
    %70 = arith.addf %55, %61 : vector<2x4x128xf32>
    %71 = arith.addf %37, %70 : vector<2x4x128xf32>
    %c2_i32 = arith.constant 2 : i32
    %72 = arith.index_cast %c2_i32 : i32 to index
    %c0_17 = arith.constant 0 : index
    %c0_18 = arith.constant 0 : index
    %73 = vector.load %arg2[%72, %c0_17, %c0_18] : memref<4x2x128xf32, #tpu.memory_space<vmem>>, vector<1x2x128xf32>
    %74 = vector.shape_cast %73 : vector<1x2x128xf32> to vector<2x128xf32>
    %75 = arith.index_cast %c2_i32 : i32 to index
    %c0_19 = arith.constant 0 : index
    %c0_20 = arith.constant 0 : index
    %76 = vector.load %arg3[%75, %c0_19, %c0_20] : memref<4x2x128xf32, #tpu.memory_space<vmem>>, vector<1x2x128xf32>
    %77 = vector.shape_cast %76 : vector<1x2x128xf32> to vector<2x128xf32>
    %78 = arith.index_cast %c2_i32 : i32 to index
    %c0_21 = arith.constant 0 : index
    %c0_22 = arith.constant 0 : index
    %79 = vector.load %arg4[%78, %c0_21, %c0_22] : memref<4x4x128xf32, #tpu.memory_space<vmem>>, vector<1x4x128xf32>
    %80 = vector.shape_cast %79 : vector<1x4x128xf32> to vector<4x128xf32>
    %81 = arith.index_cast %c2_i32 : i32 to index
    %c0_23 = arith.constant 0 : index
    %c0_24 = arith.constant 0 : index
    %82 = vector.load %arg5[%81, %c0_23, %c0_24] : memref<4x4x128xf32, #tpu.memory_space<vmem>>, vector<1x4x128xf32>
    %83 = vector.shape_cast %82 : vector<1x4x128xf32> to vector<4x128xf32>
    %84 = arith.addf %74, %77 : vector<2x128xf32>
    %85 = vector.shape_cast %84 : vector<2x128xf32> to vector<2x1x128xf32>
    %86 = vector.shape_cast %80 : vector<4x128xf32> to vector<1x4x128xf32>
    %87 = vector.broadcast %85 : vector<2x1x128xf32> to vector<2x4x128xf32>
    %88 = vector.broadcast %86 : vector<1x4x128xf32> to vector<2x4x128xf32>
    %89 = arith.mulf %87, %88 : vector<2x4x128xf32>
    %90 = vector.shape_cast %74 : vector<2x128xf32> to vector<2x1x128xf32>
    %91 = arith.subf %83, %80 : vector<4x128xf32>
    %92 = vector.shape_cast %91 : vector<4x128xf32> to vector<1x4x128xf32>
    %93 = vector.broadcast %90 : vector<2x1x128xf32> to vector<2x4x128xf32>
    %94 = vector.broadcast %92 : vector<1x4x128xf32> to vector<2x4x128xf32>
    %95 = arith.mulf %93, %94 : vector<2x4x128xf32>
    %96 = vector.shape_cast %77 : vector<2x128xf32> to vector<2x1x128xf32>
    %97 = arith.addf %80, %83 : vector<4x128xf32>
    %98 = vector.shape_cast %97 : vector<4x128xf32> to vector<1x4x128xf32>
    %99 = vector.broadcast %96 : vector<2x1x128xf32> to vector<2x4x128xf32>
    %100 = vector.broadcast %98 : vector<1x4x128xf32> to vector<2x4x128xf32>
    %101 = arith.mulf %99, %100 : vector<2x4x128xf32>
    %102 = arith.subf %89, %101 : vector<2x4x128xf32>
    %103 = arith.addf %69, %102 : vector<2x4x128xf32>
    %104 = arith.addf %89, %95 : vector<2x4x128xf32>
    %105 = arith.addf %71, %104 : vector<2x4x128xf32>
    %c3_i32 = arith.constant 3 : i32
    %106 = arith.index_cast %c3_i32 : i32 to index
    %c0_25 = arith.constant 0 : index
    %c0_26 = arith.constant 0 : index
    %107 = vector.load %arg2[%106, %c0_25, %c0_26] : memref<4x2x128xf32, #tpu.memory_space<vmem>>, vector<1x2x128xf32>
    %108 = vector.shape_cast %107 : vector<1x2x128xf32> to vector<2x128xf32>
    %109 = arith.index_cast %c3_i32 : i32 to index
    %c0_27 = arith.constant 0 : index
    %c0_28 = arith.constant 0 : index
    %110 = vector.load %arg3[%109, %c0_27, %c0_28] : memref<4x2x128xf32, #tpu.memory_space<vmem>>, vector<1x2x128xf32>
    %111 = vector.shape_cast %110 : vector<1x2x128xf32> to vector<2x128xf32>
    %112 = arith.index_cast %c3_i32 : i32 to index
    %c0_29 = arith.constant 0 : index
    %c0_30 = arith.constant 0 : index
    %113 = vector.load %arg4[%112, %c0_29, %c0_30] : memref<4x4x128xf32, #tpu.memory_space<vmem>>, vector<1x4x128xf32>
    %114 = vector.shape_cast %113 : vector<1x4x128xf32> to vector<4x128xf32>
    %115 = arith.index_cast %c3_i32 : i32 to index
    %c0_31 = arith.constant 0 : index
    %c0_32 = arith.constant 0 : index
    %116 = vector.load %arg5[%115, %c0_31, %c0_32] : memref<4x4x128xf32, #tpu.memory_space<vmem>>, vector<1x4x128xf32>
    %117 = vector.shape_cast %116 : vector<1x4x128xf32> to vector<4x128xf32>
    %118 = arith.addf %108, %111 : vector<2x128xf32>
    %119 = vector.shape_cast %118 : vector<2x128xf32> to vector<2x1x128xf32>
    %120 = vector.shape_cast %114 : vector<4x128xf32> to vector<1x4x128xf32>
    %121 = vector.broadcast %119 : vector<2x1x128xf32> to vector<2x4x128xf32>
    %122 = vector.broadcast %120 : vector<1x4x128xf32> to vector<2x4x128xf32>
    %123 = arith.mulf %121, %122 : vector<2x4x128xf32>
    %124 = vector.shape_cast %108 : vector<2x128xf32> to vector<2x1x128xf32>
    %125 = arith.subf %117, %114 : vector<4x128xf32>
    %126 = vector.shape_cast %125 : vector<4x128xf32> to vector<1x4x128xf32>
    %127 = vector.broadcast %124 : vector<2x1x128xf32> to vector<2x4x128xf32>
    %128 = vector.broadcast %126 : vector<1x4x128xf32> to vector<2x4x128xf32>
    %129 = arith.mulf %127, %128 : vector<2x4x128xf32>
    %130 = vector.shape_cast %111 : vector<2x128xf32> to vector<2x1x128xf32>
    %131 = arith.addf %114, %117 : vector<4x128xf32>
    %132 = vector.shape_cast %131 : vector<4x128xf32> to vector<1x4x128xf32>
    %133 = vector.broadcast %130 : vector<2x1x128xf32> to vector<2x4x128xf32>
    %134 = vector.broadcast %132 : vector<1x4x128xf32> to vector<2x4x128xf32>
    %135 = arith.mulf %133, %134 : vector<2x4x128xf32>
    %136 = arith.subf %123, %135 : vector<2x4x128xf32>
    %137 = arith.addf %103, %136 : vector<2x4x128xf32>
    %138 = arith.addf %123, %129 : vector<2x4x128xf32>
    %139 = arith.addf %105, %138 : vector<2x4x128xf32>
    %c4_i32 = arith.constant 4 : i32
    %c0_33 = arith.constant 0 : index
    %c0_34 = arith.constant 0 : index
    %c0_35 = arith.constant 0 : index
    %140 = vector.load %arg6[%c0_33, %c0_34, %c0_35] : memref<2x4x128xf32, #tpu.memory_space<vmem>>, vector<2x4x128xf32>
    %141 = arith.addf %140, %137 : vector<2x4x128xf32>
    %c0_36 = arith.constant 0 : index
    %c0_37 = arith.constant 0 : index
    %c0_38 = arith.constant 0 : index
    %142 = vector.load %arg6[%c0_36, %c0_37, %c0_38] : memref<2x4x128xf32, #tpu.memory_space<vmem>>, vector<2x4x128xf32>
    tpu.vector_store %arg6[%c0_36, %c0_37, %c0_38], %141 {strides = array<i32>} : memref<2x4x128xf32, #tpu.memory_space<vmem>>, vector<2x4x128xf32>,
    %c0_39 = arith.constant 0 : index
    %c0_40 = arith.constant 0 : index
    %c0_41 = arith.constant 0 : index
    %143 = vector.load %arg7[%c0_39, %c0_40, %c0_41] : memref<2x4x128xf32, #tpu.memory_space<vmem>>, vector<2x4x128xf32>
    %144 = arith.addf %143, %139 : vector<2x4x128xf32>
    %c0_42 = arith.constant 0 : index
    %c0_43 = arith.constant 0 : index
    %c0_44 = arith.constant 0 : index
    %145 = vector.load %arg7[%c0_42, %c0_43, %c0_44] : memref<2x4x128xf32, #tpu.memory_space<vmem>>, vector<2x4x128xf32>
    tpu.vector_store %arg7[%c0_42, %c0_43, %c0_44], %144 {strides = array<i32>} : memref<2x4x128xf32, #tpu.memory_space<vmem>>, vector<2x4x128xf32>,
    return
  }
  func.func @transform_0(%arg0: i32, %arg1: i32) -> (i32, i32, i32) {
    %c0_i32 = arith.constant 0 : i32
    %c0_i32_0 = arith.constant 0 : i32
    %c0_i32_1 = arith.constant 0 : i32
    return %arg1, %c0_i32, %c0_i32_0 : i32, i32, i32
  }
  func.func @transform_1(%arg0: i32, %arg1: i32) -> (i32, i32, i32) {
    %c0_i32 = arith.constant 0 : i32
    %c0_i32_0 = arith.constant 0 : i32
    %c0_i32_1 = arith.constant 0 : i32
    return %arg1, %c0_i32, %c0_i32_0 : i32, i32, i32
  }
  func.func @transform_2(%arg0: i32, %arg1: i32) -> (i32, i32, i32) {
    %c0_i32 = arith.constant 0 : i32
    %c0_i32_0 = arith.constant 0 : i32
    return %arg1, %arg0, %c0_i32 : i32, i32, i32
  }
  func.func @transform_3(%arg0: i32, %arg1: i32) -> (i32, i32, i32) {
    %c0_i32 = arith.constant 0 : i32
    %c0_i32_0 = arith.constant 0 : i32
    return %arg1, %arg0, %c0_i32 : i32, i32, i32
  }
  func.func @transform_4(%arg0: i32, %arg1: i32) -> (i32, i32, i32) {
    %c0_i32 = arith.constant 0 : i32
    %c0_i32_0 = arith.constant 0 : i32
    %c0_i32_1 = arith.constant 0 : i32
    return %c0_i32, %arg0, %c0_i32_0 : i32, i32, i32
  }
  func.func @transform_5(%arg0: i32, %arg1: i32) -> (i32, i32, i32) {
    %c0_i32 = arith.constant 0 : i32
    %c0_i32_0 = arith.constant 0 : i32
    %c0_i32_1 = arith.constant 0 : i32
    return %c0_i32, %arg0, %c0_i32_0 : i32, i32, i32
  }
}

</mosaic_0001>

<bundles_post_ra>
// kernel: tpu_custom_call.1
= control target key start
LH: loop header
LB: loop body
LE: loop exit
PB: predicated region body
PF: predicated region fallthrough
CT: control target
= control target key end

     0   :  { %11 = vsyncpa [#allocation3], 0  ;;  %s1075_s0 = inlined_call_operand.hbm [shape: f32[4,2,128], index: 0, kind: input, shape index: {}]   ;;  %s1076_s1 = inlined_call_operand.hbm [shape: f32[4,2,128], index: 1, kind: input, shape index: {}]   ;;  %s1077_s2 = inlined_call_operand.hbm [shape: f32[4,4,128], index: 2, kind: input, shape index: {}]   ;;  %s1078_s3 = inlined_call_operand.hbm [shape: f32[4,4,128], index: 3, kind: input, shape index: {}]   ;;  %s1079_s4 = inlined_call_operand.hbm [shape: f32[2,4,128], index: 4, kind: output, shape index: {0}]   ;;  %s1080_s5 = inlined_call_operand.hbm [shape: f32[2,4,128], index: 5, kind: output, shape index: {1}]  }
   0x1   :  { %12 = vsyncpa [#allocation6], 0 }
   0x2   :  { %13 = vsyncpa [#allocation9], 0 }
   0x3   :  { %14 = vsyncpa [#allocation4], 0 }
   0x4   :  { %15 = vsyncpa [#allocation12], 0  ;;  %s777_s18 = smov [#allocation5]   ;;  %s778_s20 = smov [#allocation2]  }
   0x5   :  { %s33_s19 = sshll.u32 %s777_s18, 4  ;;  %s21_s21 = sshll.u32 %s778_s20, 4  ;;  %s34_s19 = int_to_ptr.vmem [resolvable:$true] %s33_s19  ;;  %s819_s21 = int_to_ptr.vmem [resolvable:$true] %s21_s21 }
   0x6   :  { %s635_s24 = scalar_lea.hbm %s1076_s1, 128 }
   0x7   :  { %p636_p0 = scmp.ne.s32.totalorder %s1076_s1, %s635_s24  ;;  %p639_p1 = scmp.lt.u32.totalorder %s635_s24, %s1076_s1 }
   0x9   :  { %p641_p2 = pnand %p639_p1, %p636_p0 }
   0xb   :  { %644 = shalt.err (!%p641_p2)
}
   0xc   :  { %s645_s29 = scalar_lea.vmem %s34_s19, 128  ;;  %p650_p4 = scmp.lt.s32.totalorder %s34_s19, %s34_s19 }
   0xd   :  { %p646_p3 = scmp.ne.s32.totalorder %s34_s19, %s645_s29  ;;  %p651_p5 = scmp.lt.s32.totalorder %s645_s29, %s645_s29 }
   0xf   :  { %p652_p6 = por %p651_p5, %p650_p4 }
  0x11   :  { %p653_p7 = pnand %p652_p6, %p646_p3 }
  0x13   :  { %656 = shalt.err (!%p653_p7)
}
  0x14   :  { %s779_s30 = smov 32   ;;  %s780_s6 = smov 2  }
  0x15   :  { %39 = dma.hbm_to_vmem [thread:$0]  %s1076_s1, 128, %s34_s19, [#allocation6], %s779_s30, %s779_s30, %s780_s6  }
  0x16   :  { %s657_s11 = scalar_lea.hbm %s1075_s0, 128 }
  0x17   :  { %p658_p8 = scmp.ne.s32.totalorder %s1075_s0, %s657_s11  ;;  %p661_p9 = scmp.lt.u32.totalorder %s657_s11, %s1075_s0 }
  0x19   :  { %p663_p10 = pnand %p661_p9, %p658_p8 }
  0x1b   :  { %666 = shalt.err (!%p663_p10)
}
  0x1c   :  { %s667_s16 = scalar_lea.vmem %s819_s21, 128  ;;  %p672_p12 = scmp.lt.s32.totalorder %s819_s21, %s819_s21 }
  0x1d   :  { %p668_p11 = scmp.ne.s32.totalorder %s819_s21, %s667_s16  ;;  %p673_p13 = scmp.lt.s32.totalorder %s667_s16, %s667_s16 }
  0x1f   :  { %p674_p0 = por %p673_p13, %p672_p12 }
  0x21   :  { %p675_p1 = pnand %p674_p0, %p668_p11 }
  0x23   :  { %678 = shalt.err (!%p675_p1)
}
  0x24   :  { %27 = dma.hbm_to_vmem [thread:$0]  %s1075_s0, 128, %s819_s21, [#allocation3], %s779_s30, %s779_s30, %s780_s6  }
  0x25   :  { %s781_s18 = smov [#allocation7]   ;;  %s679_s23 = scalar_lea.hbm %s1077_s2, 256 }
  0x26   :  { %s45_s19 = sshll.u32 %s781_s18, 4  ;;  %p680_p2 = scmp.ne.s32.totalorder %s1077_s2, %s679_s23  ;;  %s46_s19 = int_to_ptr.vmem [resolvable:$true] %s45_s19 }
  0x27   :  { %p683_p3 = scmp.lt.u32.totalorder %s679_s23, %s1077_s2 }
  0x29   :  { %p685_p4 = pnand %p683_p3, %p680_p2 }
  0x2b   :  { %688 = shalt.err (!%p685_p4)
}
  0x2c   :  { %s689_s28 = scalar_lea.vmem %s46_s19, 256  ;;  %p694_p6 = scmp.lt.s32.totalorder %s46_s19, %s46_s19 }
  0x2d   :  { %p690_p5 = scmp.ne.s32.totalorder %s46_s19, %s689_s28  ;;  %p695_p7 = scmp.lt.s32.totalorder %s689_s28, %s689_s28 }
  0x2f   :  { %p696_p8 = por %p695_p7, %p694_p6 }
  0x31   :  { %p697_p9 = pnand %p696_p8, %p690_p5 }
  0x33   :  { %700 = shalt.err (!%p697_p9)
}
  0x34   :  { %s782_s0 = smov 64   ;;  %s783_s21 = smov 4  }
  0x35   :  { %51 = dma.hbm_to_vmem [thread:$0]  %s1077_s2, 256, %s46_s19, [#allocation6], %s782_s0, %s782_s0, %s783_s21  }
  0x36   :  { %s784_s6 = smov [#allocation8]   ;;  %s701_s10 = scalar_lea.hbm %s1078_s3, 256 }
  0x37   :  { %s57_s7 = sshll.u32 %s784_s6, 4  ;;  %p702_p10 = scmp.ne.s32.totalorder %s1078_s3, %s701_s10  ;;  %s58_s7 = int_to_ptr.vmem [resolvable:$true] %s57_s7 }
  0x38   :  { %p705_p11 = scmp.lt.u32.totalorder %s701_s10, %s1078_s3 }
  0x3a   :  { %p707_p12 = pnand %p705_p11, %p702_p10 }
  0x3c   :  { %710 = shalt.err (!%p707_p12)
}
  0x3d   :  { %s711_s15 = scalar_lea.vmem %s58_s7, 256  ;;  %p716_p0 = scmp.lt.s32.totalorder %s58_s7, %s58_s7 }
  0x3e   :  { %p712_p13 = scmp.ne.s32.totalorder %s58_s7, %s711_s15  ;;  %p717_p1 = scmp.lt.s32.totalorder %s711_s15, %s711_s15 }
  0x40   :  { %p718_p2 = por %p717_p1, %p716_p0 }
  0x42   :  { %p719_p3 = pnand %p718_p2, %p712_p13 }
  0x44   :  { %722 = shalt.err (!%p719_p3)
}
  0x45   :  { %63 = dma.hbm_to_vmem [thread:$0]  %s1078_s3, 256, %s58_s7, [#allocation9], %s782_s0, %s782_s0, %s783_s21  }
  0x46   :  { %767 = dma.done.wait [#allocation3], 128  }
  0x47   :  { %768 = vsyncadd [#allocation3], 4294967168 }
  0x48   :  { %769 = dma.done.wait [#allocation6], 384  }
  0x49   :  { %770 = vsyncadd [#allocation6], 4294966912 }
  0x4a   :  { %771 = dma.done.wait [#allocation9], 256  }
  0x4b   :  { %772 = vsyncadd [#allocation9], 4294967040  ;;  %v93_v0 = vlaneseq  ;;  %v785_v1 = vmov 0.0   ;;  %v786_v2 = vmov 1966171168   ;;  %s787_s3 = smov [#allocation10]  }
  0x4c   :  { %80 = vst [vmem:[#allocation10] sm:$0xf] %v785_v1  ;;  %81 = vst [vmem:[#allocation10 + $0x4] sm:$0xf] %v785_v1  ;;  %v91_v3 = vunpack.c.l.s4 %v786_v2  ;;  %v84_v8 = vld [vmem:[#allocation2] sm:$0x3] }
  0x4d   :  { %82 = vst [vmem:[#allocation11] sm:$0xf] %v785_v1  ;;  %83 = vst [vmem:[#allocation11 + $0x4] sm:$0xf] %v785_v1  ;;  %v94_v4 = vshrl.u32 %v93_v0, 7  ;;  %s593_s1 = sshll.u32 %s787_s3, 4  ;;  %s594_s1 = int_to_ptr.vmem [resolvable:$true] %s593_s1 }
  0x4e   :  { %v92_v5 = vunpack.c.0.s8 %v91_v3  ;;  %v85_v9 = vld [vmem:[#allocation5] sm:$0x3]  ;;  %v884_v10 = vld [vmem:[#allocation7] sm:$0xf]  ;;  %v87_v11 = vld [vmem:[#allocation8] sm:$0xf]  ;;  %p728_p5 = scmp.lt.s32.totalorder %s594_s1, %s594_s1 }
  0x4f   :  { %v882_v7 = vsub.s32 0, %v94_v4  ;;  %v88_v12 = vadd.f32 %v85_v9, %v84_v8  ;;  %v887_v14 = vld [vmem:[#allocation2 + $0x2] sm:$0x3]  ;;  %v207_v15 = vld [vmem:[#allocation5 + $0x2] sm:$0x3]  ;;  %v893_v17 = vadd.f32 %v87_v11, %v884_v10  ;;  %v904_v23 = vsub.f32 %v87_v11, %v884_v10  ;;  %s723_s17 = scalar_lea.vmem %s594_s1, 128 }
  0x50   :  { %v880_v6 = vsub.s32 %v92_v5, %v94_v4  ;;  %v895_v18 = vld [vmem:[#allocation7 + $0x4] sm:$0xf]  ;;  %v897_v19 = vld [vmem:[#allocation8 + $0x4] sm:$0xf]  ;;  %v212_v20 = vadd.f32 %v207_v15, %v887_v14  ;;  %v331_v27 = vld [vmem:[#allocation5 + $0x4] sm:$0x3]  ;;  %p724_p4 = scmp.ne.s32.totalorder %s594_s1, %s723_s17  ;;  %p729_p6 = scmp.lt.s32.totalorder %s723_s17, %s723_s17 }
  0x51   :  { %v901_v22 = vld [vmem:[#allocation2 + $0x4] sm:$0x3]  ;;  %v910_v26 = vadd.f32 %v897_v19, %v895_v18  ;;  %v912_v28 = vld [vmem:[#allocation7 + $0x8] sm:$0xf]  ;;  %v914_v29 = vld [vmem:[#allocation8 + $0x8] sm:$0xf] }
  0x52   :  { %v167_v13 = vrot.slane %v85_v9, %v880_v6  ;;  %v890_v16 = vrot.slane %v84_v8, %v880_v6  ;;  %v291_v21 = vrot.slane %v207_v15, %v880_v6  ;;  %v96_v24 = vrot.slane %v88_v12, %v880_v6  ;;  %v920_v35 = vld [vmem:[#allocation2 + $0x6] sm:$0x3]  ;;  %v455_v36 = vld [vmem:[#allocation5 + $0x6] sm:$0x3]  ;;  %v933_v45 = vld [vmem:[#allocation7 + $0xc] sm:$0xf]  ;;  %p730_p7 = por %p729_p6, %p728_p5 }
  0x53   :  { %v220_v31 = vrot.slane %v212_v20, %v880_v6  ;;  %v336_v33 = vadd.f32 %v331_v27, %v901_v22  ;;  %v415_v34 = vrot.slane %v331_v27, %v880_v6  ;;  %v926_v39 = vadd.f32 %v914_v29, %v912_v28  ;;  %v935_v46 = vld [vmem:[#allocation8 + $0xc] sm:$0xf] }
  0x54   :  { %v175_v25 = vrot.slane %v167_v13, %v880_v6  ;;  %v168_v30 = vcombine.high %v167_v13, %v167_v13  ;;  %v299_v32 = vrot.slane %v291_v21, %v880_v6  ;;  %v104_v37 = vrot.slane %v96_v24, %v880_v6  ;;  %p731_p8 = pnand %p730_p7, %p724_p4 }
  0x55   :  { %v460_v40 = vadd.f32 %v455_v36, %v920_v35  ;;  %v228_v41 = vrot.slane %v220_v31, %v880_v6  ;;  %v344_v43 = vrot.slane %v336_v33, %v880_v6  ;;  %v423_v44 = vrot.slane %v415_v34, %v880_v6 }
  0x56   :  { %v187_v38 = vrot.slane %v175_v25, %v882_v7  ;;  %v311_v42 = vrot.slane %v299_v32, %v882_v7  ;;  %v115_v47 = vrot.slane %v104_v37, %v882_v7  ;;  %v539_v50 = vrot.slane %v455_v36, %v880_v6 }
  0x57   :  { %v468_v49 = vrot.slane %v460_v40, %v880_v6  ;;  %v239_v51 = vrot.slane %v228_v41, %v882_v7  ;;  %v352_v53 = vrot.slane %v344_v43, %v880_v6  ;;  %v435_v54 = vrot.slane %v423_v44, %v882_v7 }
  0x58   :  { %v194_v48 = vmul.f32 %v187_v38, %v893_v17  ;;  %v318_v52 = vmul.f32 %v311_v42, %v910_v26  ;;  %v946_v55 = vmul.f32 %v115_v47, %v884_v10  ;;  %v547_v57 = vrot.slane %v539_v50, %v880_v6  ;;  %v576_v38 = vld [vmem:[#allocation10] sm:$0xf] }
  0x59   :  { %v476_v56 = vrot.slane %v468_v49, %v880_v6  ;;  %v555_v58 = vadd.f32 %v935_v46, %v933_v45  ;;  %v953_v59 = vmul.f32 %v239_v51, %v895_v18  ;;  %v363_v60 = vrot.slane %v352_v53, %v882_v7 }
  0x5a   :  { %v442_v61 = vmul.f32 %v435_v54, %v926_v39  ;;  %v97_v62 = vcombine.high %v96_v24, %v96_v24  ;;  %v196_v63 = vsub.f32 %v946_v55, %v194_v48  ;;  %v559_v1 = vrot.slane %v547_v57, %v882_v7 }
  0x5b   :  { %v487_v0 = vrot.slane %v476_v56, %v882_v7  ;;  %v182_v2 = vrot.slane %v168_v30, %v880_v6  ;;  %v320_v3 = vsub.f32 %v953_v59, %v318_v52  ;;  %v963_v4 = vmul.f32 %v363_v60, %v912_v28 }
  0x5c   :  { %v111_v5 = vrot.slane %v97_v62, %v880_v6  ;;  %v221_v8 = vcombine.high %v220_v31, %v220_v31  ;;  %v566_v11 = vmul.f32 %v559_v1, %v555_v58  ;;  %v292_v13 = vcombine.high %v291_v21, %v291_v21 }
  0x5d   :  { %v967_v9 = vmul.f32 %v487_v0, %v933_v45  ;;  %v191_v12 = vrot.slane %v182_v2, %v882_v7  ;;  %v322_v15 = vadd.f32 %v320_v3, %v196_v63  ;;  %v444_v20 = vsub.f32 %v963_v4, %v442_v61 }
  0x5e   :  { %v119_v24 = vrot.slane %v111_v5, %v882_v7  ;;  %v235_v25 = vrot.slane %v221_v8, %v880_v6  ;;  %v306_v31 = vrot.slane %v292_v13, %v880_v6  ;;  %v345_v32 = vcombine.high %v344_v43, %v344_v43 }
  0x5f   :  { %v568_v27 = vsub.f32 %v967_v9, %v566_v11  ;;  %v195_v30 = vmul.f32 %v191_v12, %v893_v17  ;;  %v446_v33 = vadd.f32 %v444_v20, %v322_v15  ;;  %v416_v37 = vcombine.high %v415_v34, %v415_v34 }
  0x60   :  { %v977_v36 = vmul.f32 %v119_v24, %v884_v10  ;;  %v243_v21 = vrot.slane %v235_v25, %v882_v7  ;;  %v315_v40 = vrot.slane %v306_v31, %v882_v7  ;;  %v359_v41 = vrot.slane %v345_v32, %v880_v6  ;;  %v577_v24 = vld [vmem:[#allocation10 + $0x4] sm:$0xf] }
  0x61   :  { %v469_v42 = vcombine.high %v468_v49, %v468_v49  ;;  %v540_v44 = vcombine.high %v539_v50, %v539_v50  ;;  %v570_v47 = vadd.f32 %v568_v27, %v446_v33  ;;  %v430_v43 = vrot.slane %v416_v37, %v880_v6 }
  0x62   :  { %v197_v17 = vsub.f32 %v977_v36, %v195_v30  ;;  %v984_v48 = vmul.f32 %v243_v21, %v895_v18  ;;  %v319_v10 = vmul.f32 %v315_v40, %v910_v26  ;;  %v367_v51 = vrot.slane %v359_v41, %v882_v7 }
  0x63   :  { %v483_v34 = vrot.slane %v469_v42, %v880_v6  ;;  %v554_v52 = vrot.slane %v540_v44, %v880_v6  ;;  %v578_v53 = vadd.f32 %v576_v38, %v570_v47  ;;  %v439_v49 = vrot.slane %v430_v43, %v882_v7 }
  0x64   :  { %v139_v50 = vrot.slane %v890_v16, %v880_v6  ;;  %v255_v54 = vrot.slane %v887_v14, %v880_v6  ;;  %v321_v56 = vsub.f32 %v984_v48, %v319_v10  ;;  %v998_v57 = vmul.f32 %v367_v51, %v912_v28 }
  0x65   :  { %v491_v26 = vrot.slane %v483_v34, %v882_v7  ;;  %v563_v60 = vrot.slane %v554_v52, %v882_v7  ;;  %580 = vst [vmem:[#allocation10] sm:$0xf] %v578_v53  ;;  %v443_v61 = vmul.f32 %v439_v49, %v926_v39  ;;  %v271_v0 = vsub.f32 %v897_v19, %v895_v18 }
  0x66   :  { %v151_v62 = vrot.slane %v139_v50, %v882_v7  ;;  %v263_v63 = vrot.slane %v255_v54, %v880_v6  ;;  %v323_v14 = vadd.f32 %v321_v56, %v197_v17  ;;  %v379_v3 = vrot.slane %v901_v22, %v880_v6 }
  0x67   :  { %v1008_v1 = vmul.f32 %v491_v26, %v933_v45  ;;  %v567_v2 = vmul.f32 %v563_v60, %v555_v58  ;;  %v445_v5 = vsub.f32 %v998_v57, %v443_v61  ;;  %v395_v11 = vsub.f32 %v914_v29, %v912_v28 }
  0x68   :  { %v158_v8 = vmul.f32 %v151_v62, %v904_v23  ;;  %v275_v39 = vrot.slane %v263_v63, %v882_v7  ;;  %v387_v18 = vrot.slane %v379_v3, %v880_v6  ;;  %v503_v19 = vrot.slane %v920_v35, %v880_v6 }
  0x69   :  { %v569_v12 = vsub.f32 %v1008_v1, %v567_v2  ;;  %v519_v58 = vsub.f32 %v935_v46, %v933_v45  ;;  %v447_v22 = vadd.f32 %v445_v5, %v323_v14  ;;  %v132_v20 = vcombine.high %v890_v16, %v890_v16 }
  0x6a   :  { %v200_v13 = vadd.f32 %v158_v8, %v946_v55  ;;  %v282_v15 = vmul.f32 %v275_v39, %v271_v0  ;;  %v399_v28 = vrot.slane %v387_v18, %v882_v7  ;;  %v511_v29 = vrot.slane %v503_v19, %v880_v6 }
  0x6b   :  { %v256_v25 = vcombine.high %v255_v54, %v255_v54  ;;  %v380_v27 = vcombine.high %v379_v3, %v379_v3  ;;  %v571_v35 = vadd.f32 %v569_v12, %v447_v22  ;;  %v146_v45 = vrot.slane %v132_v20, %v880_v6 }
  0x6c   :  { %v324_v30 = vadd.f32 %v282_v15, %v953_v59  ;;  %v504_v46 = vcombine.high %v503_v19, %v503_v19  ;;  %v406_v55 = vmul.f32 %v399_v28, %v395_v11  ;;  %v523_v31 = vrot.slane %v511_v29, %v882_v7 }
  0x6d   :  { %v270_v16 = vrot.slane %v256_v25, %v880_v6  ;;  %v394_v32 = vrot.slane %v380_v27, %v880_v6  ;;  %v579_v33 = vadd.f32 %v577_v24, %v571_v35  ;;  %v155_v37 = vrot.slane %v146_v45, %v882_v7 }
  0x6e   :  { %v326_v21 = vadd.f32 %v324_v30, %v200_v13  ;;  %v518_v38 = vrot.slane %v504_v46, %v880_v6  ;;  %v448_v40 = vadd.f32 %v406_v55, %v963_v4  ;;  %v530_v59 = vmul.f32 %v523_v31, %v519_v58 }
  0x6f   :  { %v279_v41 = vrot.slane %v270_v16, %v882_v7  ;;  %v403_v42 = vrot.slane %v394_v32, %v882_v7  ;;  %581 = vst [vmem:[#allocation10 + $0x4] sm:$0xf] %v579_v33  ;;  %v159_v44 = vmul.f32 %v155_v37, %v904_v23 }
  0x70   :  { %v527_v47 = vrot.slane %v518_v38, %v882_v7  ;;  %v450_v17 = vadd.f32 %v448_v40, %v326_v21  ;;  %v572_v43 = vadd.f32 %v530_v59, %v967_v9 }
  0x71   :  { %v283_v10 = vmul.f32 %v279_v41, %v271_v0  ;;  %v407_v51 = vmul.f32 %v403_v42, %v395_v11 }
  0x72   :  { %734 = shalt.err (!%p731_p8)
}
  0x73   :  { %s735_s20 = scalar_lea.hbm %s1079_s4, 128 }
  0x74   :  { %p736_p9 = scmp.ne.s32.totalorder %s1079_s4, %s735_s20  ;;  %p739_p10 = scmp.lt.u32.totalorder %s735_s20, %s1079_s4 }
  0x76   :  { %p741_p11 = pnand %p739_p10, %p736_p9 }
  0x78   :  { %744 = shalt.err (!%p741_p11)
}
  0x79   :  { %599 = dma.vmem_to_hbm [thread:$0]  %s594_s1, 128, %s1079_s4, [#allocation4], %s782_s0, %s782_s0, %s783_s21   ;;  %v582_v6 = vld [vmem:[#allocation11] sm:$0xf]  ;;  %v201_v7 = vadd.f32 %v159_v44, %v977_v36  ;;  %v531_v23 = vmul.f32 %v527_v47, %v519_v58  ;;  %v574_v4 = vadd.f32 %v572_v43, %v450_v17  ;;  %v325_v9 = vadd.f32 %v283_v10, %v984_v48  ;;  %v583_v54 = vld [vmem:[#allocation11 + $0x4] sm:$0xf] }
  0x7a   :  { %v449_v34 = vadd.f32 %v407_v51, %v998_v57  ;;  %s788_s28 = smov [#allocation11]  }
  0x7b   :  { %v584_v52 = vadd.f32 %v582_v6, %v574_v4  ;;  %v327_v53 = vadd.f32 %v325_v9, %v201_v7  ;;  %v573_v49 = vadd.f32 %v531_v23, %v1008_v1  ;;  %s605_s29 = sshll.u32 %s788_s28, 4  ;;  %s606_s29 = int_to_ptr.vmem [resolvable:$true] %s605_s29 }
  0x7c   :  { %s745_s4 = scalar_lea.vmem %s606_s29, 128  ;;  %p750_p13 = scmp.lt.s32.totalorder %s606_s29, %s606_s29 }
  0x7d   :  { %586 = vst [vmem:[#allocation11] sm:$0xf] %v584_v52  ;;  %v451_v50 = vadd.f32 %v449_v34, %v327_v53  ;;  %p746_p12 = scmp.ne.s32.totalorder %s606_s29, %s745_s4  ;;  %p751_p0 = scmp.lt.s32.totalorder %s745_s4, %s745_s4 }
  0x7f   :  { %v575_v56 = vadd.f32 %v573_v49, %v451_v50  ;;  %p752_p1 = por %p751_p0, %p750_p13 }
  0x81   :  { %v585_v26 = vadd.f32 %v583_v54, %v575_v56  ;;  %p753_p2 = pnand %p752_p1, %p746_p12 }
  0x83   :  { %587 = vst [vmem:[#allocation11 + $0x4] sm:$0xf] %v585_v26 }
  0x84   :  { %756 = shalt.err (!%p753_p2)
}
  0x85   :  { %s757_s7 = scalar_lea.hbm %s1080_s5, 128 }
  0x86   :  { %p758_p3 = scmp.ne.s32.totalorder %s1080_s5, %s757_s7  ;;  %p761_p4 = scmp.lt.u32.totalorder %s757_s7, %s1080_s5 }
  0x88   :  { %p763_p5 = pnand %p761_p4, %p758_p3 }
  0x8a   :  { %766 = shalt.err (!%p763_p5)
}
  0x8b   :  { %611 = dma.vmem_to_hbm [thread:$0]  %s606_s29, 128, %s1080_s5, [#allocation12], %s782_s0, %s782_s0, %s783_s21  }
  0x8c   :  { %773 = dma.done.wait [#allocation4], 128  }
  0x8d   :  { %774 = vsyncadd [#allocation4], 4294967168 }
  0x8e   :  { %775 = dma.done.wait [#allocation12], 128  }
  0x8f   :  { %776 = vsyncadd [#allocation12], 4294967168 }
  0x90   :  { %618 = vsyncpa [#allocation3], 1 }
  0x91   :  { %619 = vsyncpa [#allocation6], 1 }
  0x92   :  { %620 = vsyncpa [#allocation9], 1 }
  0x93   :  { %621 = vsyncpa [#allocation4], 1 }
  0x94   :  { %622 = vsyncpa [#allocation12], 1 }

</bundles_post_ra>
